<compile_context>
chip_gen: v7x
topology: tpu7x:2x2x1
jax: 0.10.0
libtpu: 0.0.40
codegen_flags: <defaults>
</compile_context>

<pallas_src>
from functools import partial

import jax
import jax.numpy as jnp
from jax.experimental import pallas as pl
from jax.experimental.pallas import tpu as pltpu

# Keep h fully VMEM-resident in gin_conv as long as it stays under this budget
# (bf16 bytes).  8 MiB <=> n_pad <= 32768 at nhid padded to 128.
_X_RESIDENT_BYTES = 8 * 1024 * 1024


def _round_up(x, m):
    return ((x + m - 1) // m) * m


def _node_tiles(n):
    """Pick (tm, tk, n_pad) for the N x N aggregation matmul."""
    n_pad = _round_up(n, 128)
    if n_pad <= 1024:
        # Whole graph fits in one block; no point tiling.
        return n_pad, n_pad, n_pad
    # Large tiles amortize the ~0.35 us per-grid-step overhead; 512/1024 bf16
    # A tiles (double-buffered) plus the resident h stay well under even the
    # 16 MiB v5e scoped-VMEM default.
    t = 512 if n_pad <= 4096 else 1024
    n_pad = _round_up(n, t)
    return t, t, n_pad


# ---------------------------------------------------------------------------
# Kernels
# ---------------------------------------------------------------------------
def _linear_kernel(x_ref, w_ref, b_ref, o_ref):
    # y = x @ W + b  (W already stored [in, out] in bf16; bias f32)
    y = jnp.dot(x_ref[...], w_ref[...], preferred_element_type=jnp.float32)
    o_ref[...] = (y + b_ref[...]).astype(o_ref.dtype)


def linear_rows(x, w, b, tm):
    n, f = x.shape
    h = w.shape[1]
    return pl.pallas_call(
        _linear_kernel,
        out_shape=jax.ShapeDtypeStruct((n, h), jnp.bfloat16),
        grid_spec=pltpu.PrefetchScalarGridSpec(
            num_scalar_prefetch=0,
            grid=(n // tm,),
            in_specs=[
                pl.BlockSpec((tm, f), lambda i: (i, 0)),
                pl.BlockSpec((f, h), lambda i: (0, 0)),
                pl.BlockSpec((1, h), lambda i: (0, 0)),
            ],
            out_specs=pl.BlockSpec((tm, h), lambda i: (i, 0)),
        ),
        compiler_params=pltpu.CompilerParams(dimension_semantics=("parallel",)),
    )(x, w, b)


def _gin_conv_kernel(a_ref, x_ref, w1_ref, b1_ref, w2_ref, b2_ref, o_ref, acc_ref):
    # GINConv: nn((1+eps)*x + sum_{j in N(i)} x_j) == nn(A_hat @ x), plus the
    # outer F.relu from serverGIN.forward, all fused in the reduction epilogue.
    tk = a_ref.shape[1]
    k = pl.program_id(1)

    @pl.when(k == 0)
    def _():
        acc_ref[...] = jnp.zeros_like(acc_ref)

    if x_ref.shape[0] == tk:
        # Streamed x tile (only for very large graphs) or single-block case.
        x_blk = x_ref[...]
    else:
        # h fully resident in VMEM; slice the current K window in-register.
        start = pl.multiple_of(k * tk, 128)
        x_blk = x_ref[pl.ds(start, tk), :]

    acc_ref[...] += jnp.dot(a_ref[...], x_blk, preferred_element_type=jnp.float32)

    @pl.when(k == pl.num_programs(1) - 1)
    def _():
        h = jnp.dot(acc_ref[...].astype(jnp.bfloat16), w1_ref[...],
                    preferred_element_type=jnp.float32) + b1_ref[...]
        h = jnp.maximum(h, 0.0)
        h = jnp.dot(h.astype(jnp.bfloat16), w2_ref[...],
                    preferred_element_type=jnp.float32) + b2_ref[...]
        o_ref[...] = jnp.maximum(h, 0.0).astype(o_ref.dtype)  # outer F.relu


def gin_conv(a_hat, x, w1, b1, w2, b2, tm, tk):
    n_pad, h = x.shape
    resident = n_pad * h * x.dtype.itemsize <= _X_RESIDENT_BYTES
    if resident:
        # Constant block index: Pallas DMAs h exactly once per pallas_call.
        x_spec = pl.BlockSpec((n_pad, h), lambda i, k: (0, 0))
    else:
        x_spec = pl.BlockSpec((tk, h), lambda i, k: (k, 0))
    return pl.pallas_call(
        _gin_conv_kernel,
        out_shape=jax.ShapeDtypeStruct((n_pad, h), jnp.bfloat16),
        grid_spec=pltpu.PrefetchScalarGridSpec(
            num_scalar_prefetch=0,
            grid=(n_pad // tm, n_pad // tk),            # reduction axis last
            in_specs=[
                pl.BlockSpec((tm, tk), lambda i, k: (i, k)),   # A_hat tile
                x_spec,                                        # resident h
                pl.BlockSpec(w1.shape, lambda i, k: (0, 0)),
                pl.BlockSpec((1, h), lambda i, k: (0, 0)),
                pl.BlockSpec(w2.shape, lambda i, k: (0, 0)),
                pl.BlockSpec((1, h), lambda i, k: (0, 0)),
            ],
            out_specs=pl.BlockSpec((tm, h), lambda i, k: (i, 0)),
            scratch_shapes=[pltpu.VMEM((tm, h), jnp.float32)],
        ),
        compiler_params=pltpu.CompilerParams(
            dimension_semantics=("parallel", "arbitrary")
        ),
    )(a_hat, x, w1, b1, w2, b2)


def _head_kernel(p_ref, x_ref, wp_ref, bp_ref, wr_ref, br_ref, o_ref, acc_ref):
    # global_add_pool (K-reduction) -> post Linear+ReLU -> readout -> log_softmax
    k = pl.program_id(0)

    @pl.when(k == 0)
    def _():
        acc_ref[...] = jnp.zeros_like(acc_ref)

    acc_ref[...] += jnp.dot(p_ref[...], x_ref[...],
                            preferred_element_type=jnp.float32)

    @pl.when(k == pl.num_programs(0) - 1)
    def _():
        h = jnp.dot(acc_ref[...].astype(jnp.bfloat16), wp_ref[...],
                    preferred_element_type=jnp.float32) + bp_ref[...]
        h = jnp.maximum(h, 0.0)
        logits = jnp.dot(h.astype(jnp.bfloat16), wr_ref[...],
                         preferred_element_type=jnp.float32) + br_ref[...]
        z = logits - jnp.max(logits, axis=-1, keepdims=True)
        o_ref[...] = z - jnp.log(jnp.sum(jnp.exp(z), axis=-1, keepdims=True))


def head(pool, x, wp, bp, wr, br, tk):
    g_pad = pool.shape[0]
    n_pad, hdim = x.shape
    c = wr.shape[1]
    # TODO(synk): fold this pooling accumulation into the last gin_conv
    # epilogue so h never makes this extra HBM round trip.
    return pl.pallas_call(
        _head_kernel,
        out_shape=jax.ShapeDtypeStruct((g_pad, c), jnp.float32),
        grid_spec=pltpu.PrefetchScalarGridSpec(
            num_scalar_prefetch=0,
            grid=(n_pad // tk,),
            in_specs=[
                pl.BlockSpec((g_pad, tk), lambda k: (0, k)),
                pl.BlockSpec((tk, hdim), lambda k: (k, 0)),
                pl.BlockSpec(wp.shape, lambda k: (0, 0)),
                pl.BlockSpec((1, hdim), lambda k: (0, 0)),
                pl.BlockSpec(wr.shape, lambda k: (0, 0)),
                pl.BlockSpec((1, c), lambda k: (0, 0)),
            ],
            out_specs=pl.BlockSpec((g_pad, c), lambda k: (0, 0)),
            scratch_shapes=[pltpu.VMEM((g_pad, hdim), jnp.float32)],
        ),
        compiler_params=pltpu.CompilerParams(dimension_semantics=("arbitrary",)),
    )(pool, x, wp, bp, wr, br)


# ---------------------------------------------------------------------------
# Parameter init (deterministic, PyTorch nn.Linear-style uniform), stored
# pre-transposed as [in, out], zero-padded to lane-dense widths, weights in
# bf16 (single-pass MXU operands), biases kept f32.
# ---------------------------------------------------------------------------
def _init_linear(key, fan_in, fan_out, in_pad, out_pad):
    kw, kb = jax.random.split(key)
    bound = 1.0 / jnp.sqrt(jnp.float32(fan_in))
    w = jax.random.uniform(kw, (fan_in, fan_out), jnp.float32, -bound, bound)
    b = jax.random.uniform(kb, (1, fan_out), jnp.float32, -bound, bound)
    w_p = (jnp.zeros((in_pad, out_pad), jnp.float32)
           .at[:fan_in, :fan_out].set(w).astype(jnp.bfloat16))
    b_p = jnp.zeros((1, out_pad), jnp.float32).at[:, :fan_out].set(b)
    return w_p, b_p


def init_params(key, nfeat, nhid, nclass, nlayer):
    f_pad = _round_up(nfeat, 128)
    h_pad = _round_up(nhid, 128)
    keys = jax.random.split(key, 3 + 2 * nlayer)
    params = {}
    params["pre_w"], params["pre_b"] = _init_linear(keys[0], nfeat, nhid, f_pad, h_pad)
    convs = []
    for l in range(nlayer):
        w1, b1 = _init_linear(keys[1 + 2 * l], nhid, nhid, h_pad, h_pad)
        w2, b2 = _init_linear(keys[2 + 2 * l], nhid, nhid, h_pad, h_pad)
        convs.append((w1, b1, w2, b2))
    params["convs"] = convs
    params["post_w"], params["post_b"] = _init_linear(
        keys[1 + 2 * nlayer], nhid, nhid, h_pad, h_pad
    )
    params["read_w"], params["read_b"] = _init_linear(
        keys[2 + 2 * nlayer], nhid, nclass, h_pad, nclass
    )
    return params


# ---------------------------------------------------------------------------
# Forward (inference: F.dropout(training=False) is identity, omitted)
# ---------------------------------------------------------------------------
@partial(jax.jit, static_argnames=("num_graphs",))
def server_gin_forward(params, x, edge_index, batch, num_graphs):
    n, nfeat = x.shape
    tm, tk, n_pad = _node_tiles(n)
    f_pad = params["pre_w"].shape[0]
    g_pad = _round_up(max(num_graphs, 1), 8)

    # A_hat = A + I built directly in bf16, self-loop fused into the scatter
    # (no f32 N^2 intermediate).  Message flow src -> dst: out[dst] += x[src].
    # Padded rows/cols are zero, so padding never leaks into real nodes.
    src = edge_index[0].astype(jnp.int32)
    dst = edge_index[1].astype(jnp.int32)
    diag = jnp.arange(n, dtype=jnp.int32)
    rows = jnp.concatenate([dst, diag])
    cols = jnp.concatenate([src, diag])
    a_hat = jnp.zeros((n_pad, n_pad), jnp.bfloat16).at[rows, cols].add(1.0)

    batch_pad = jnp.full((n_pad,), -1, jnp.int32).at[:n].set(batch.astype(jnp.int32))
    pool = (batch_pad[None, :] == jnp.arange(g_pad)[:, None]).astype(jnp.bfloat16)

    x_pad = (jnp.zeros((n_pad, f_pad), jnp.bfloat16)
             .at[:n, :nfeat].set(x.astype(jnp.bfloat16)))

    h = linear_rows(x_pad, params["pre_w"], params["pre_b"], tm)       # self.pre
    for (w1, b1, w2, b2) in params["convs"]:
        # GINConv + outer ReLU fused; F.dropout is identity at inference.
        h = gin_conv(a_hat, h, w1, b1, w2, b2, tm, tk)
    out = head(pool, h, params["post_w"], params["post_b"],
               params["read_w"], params["read_b"], tk)
    return out[:num_graphs]


# ---------------------------------------------------------------------------
if __name__ == "__main__":
    nfeat, nhid, nclass, nlayer = 8, 32, 4, 2
    num_nodes, num_edges, num_graphs = 16, 32, 2

    key = jax.random.PRNGKey(0)
    k_param, k_x, k_src, k_dst = jax.random.split(key, 4)

    params = init_params(k_param, nfeat, nhid, nclass, nlayer)

    x = jax.random.normal(k_x, (num_nodes, nfeat), jnp.float32)
    src = jax.random.randint(k_src, (num_edges,), 0, num_nodes, jnp.int32)
    dst = jax.random.randint(k_dst, (num_edges,), 0, num_nodes, jnp.int32)
    edge_index = jnp.stack([src, dst], axis=0)                        # [2, E]
    batch = jnp.concatenate([jnp.zeros(num_nodes // 2, jnp.int32),
                             jnp.ones(num_nodes - num_nodes // 2, jnp.int32)])

    out = server_gin_forward(params, x, edge_index, batch, num_graphs)
    out = jax.block_until_ready(out)

    assert out.shape == (num_graphs, nclass)
    assert bool(jnp.all(jnp.isfinite(out)))
    # rows of log_softmax should exp-sum to ~1
    assert bool(jnp.allclose(jnp.sum(jnp.exp(out), axis=1), 1.0, atol=1e-3))
    print("KERNEL_OK")
</pallas_src>

<mosaic_0001>
module attributes {stable_mosaic.version = 11 : i64} {
  func.func @_gin_conv_kernel(%arg0: i32, %arg1: i32, %arg2: memref<128x128xbf16, #tpu.memory_space<vmem>>, %arg3: memref<128x128xbf16, #tpu.memory_space<vmem>>, %arg4: memref<128x128xbf16, #tpu.memory_space<vmem>>, %arg5: memref<1x128xf32, #tpu.memory_space<vmem>>, %arg6: memref<128x128xbf16, #tpu.memory_space<vmem>>, %arg7: memref<1x128xf32, #tpu.memory_space<vmem>>, %arg8: memref<128x128xbf16, #tpu.memory_space<vmem>>, %arg9: memref<128x128xf32, #tpu.memory_space<vmem>>) attributes {dimension_semantics = [#tpu.dimension_semantics<parallel>, #tpu.dimension_semantics<arbitrary>], iteration_bounds = array<i64: 1, 1>, scalar_prefetch = 0 : i64, scratch_operands = 1 : i64, tpu.core_type = #tpu.core_type<tc>, window_params = [{transform_indices = @transform_0, window_bounds = array<i64: 128, 128>}, {pipeline_mode = #tpu.pipeline_mode<synchronous>, transform_indices = @transform_1, window_bounds = array<i64: 128, 128>}, {pipeline_mode = #tpu.pipeline_mode<synchronous>, transform_indices = @transform_2, window_bounds = array<i64: 128, 128>}, {pipeline_mode = #tpu.pipeline_mode<synchronous>, transform_indices = @transform_3, window_bounds = array<i64: 1, 128>}, {pipeline_mode = #tpu.pipeline_mode<synchronous>, transform_indices = @transform_4, window_bounds = array<i64: 128, 128>}, {pipeline_mode = #tpu.pipeline_mode<synchronous>, transform_indices = @transform_5, window_bounds = array<i64: 1, 128>}, {transform_indices = @transform_6, window_bounds = array<i64: 128, 128>}]} {
    %c0_i32 = arith.constant 0 : i32
    %0 = arith.cmpi eq, %arg1, %c0_i32 : i32
    %1 = arith.extui %0 : i1 to i32
    %c0_i32_0 = arith.constant 0 : i32
    %2 = arith.cmpi ne, %1, %c0_i32_0 : i32
    scf.if %2 {
      %cst_10 = arith.constant 0.000000e+00 : f32
      %12 = vector.broadcast %cst_10 : f32 to vector<128x128xf32>
      %c0_11 = arith.constant 0 : index
      %c0_12 = arith.constant 0 : index
      %13 = vector.load %arg9[%c0_11, %c0_12] : memref<128x128xf32, #tpu.memory_space<vmem>>, vector<128x128xf32>
      tpu.vector_store %arg9[%c0_11, %c0_12], %12 {strides = array<i32>} : memref<128x128xf32, #tpu.memory_space<vmem>>, vector<128x128xf32>,
    } else {
    }
    %c0 = arith.constant 0 : index
    %c0_1 = arith.constant 0 : index
    %3 = vector.load %arg3[%c0, %c0_1] : memref<128x128xbf16, #tpu.memory_space<vmem>>, vector<128x128xbf16>
    %c0_2 = arith.constant 0 : index
    %c0_3 = arith.constant 0 : index
    %4 = vector.load %arg9[%c0_2, %c0_3] : memref<128x128xf32, #tpu.memory_space<vmem>>, vector<128x128xf32>
    %c0_4 = arith.constant 0 : index
    %c0_5 = arith.constant 0 : index
    %5 = vector.load %arg2[%c0_4, %c0_5] : memref<128x128xbf16, #tpu.memory_space<vmem>>, vector<128x128xbf16>
    %cst = arith.constant dense<0.000000e+00> : vector<128x128xf32>
    %6 = tpu.matmul %5, %3, %cst {dimension_numbers = #tpu.dot_dimension_numbers<[1], [0], [0], [1], [0, 0, 1, 1], [], []>} : vector<128x128xbf16>, vector<128x128xbf16>, vector<128x128xf32> -> vector<128x128xf32>
    %7 = arith.addf %4, %6 : vector<128x128xf32>
    %c0_6 = arith.constant 0 : index
    %c0_7 = arith.constant 0 : index
    %8 = vector.load %arg9[%c0_6, %c0_7] : memref<128x128xf32, #tpu.memory_space<vmem>>, vector<128x128xf32>
    tpu.vector_store %arg9[%c0_6, %c0_7], %7 {strides = array<i32>} : memref<128x128xf32, #tpu.memory_space<vmem>>, vector<128x128xf32>,
    %c0_i32_8 = arith.constant 0 : i32
    %9 = arith.cmpi eq, %arg1, %c0_i32_8 : i32
    %10 = arith.extui %9 : i1 to i32
    %c0_i32_9 = arith.constant 0 : i32
    %11 = arith.cmpi ne, %10, %c0_i32_9 : i32
    scf.if %11 {
      %c0_10 = arith.constant 0 : index
      %c0_11 = arith.constant 0 : index
      %12 = vector.load %arg9[%c0_10, %c0_11] : memref<128x128xf32, #tpu.memory_space<vmem>>, vector<128x128xf32>
      %13 = arith.truncf %12 : vector<128x128xf32> to vector<128x128xbf16>
      %c0_12 = arith.constant 0 : index
      %c0_13 = arith.constant 0 : index
      %14 = vector.load %arg4[%c0_12, %c0_13] : memref<128x128xbf16, #tpu.memory_space<vmem>>, vector<128x128xbf16>
      %cst_14 = arith.constant dense<0.000000e+00> : vector<128x128xf32>
      %15 = tpu.matmul %13, %14, %cst_14 {dimension_numbers = #tpu.dot_dimension_numbers<[1], [0], [0], [1], [0, 0, 1, 1], [], []>} : vector<128x128xbf16>, vector<128x128xbf16>, vector<128x128xf32> -> vector<128x128xf32>
      %c0_15 = arith.constant 0 : index
      %c0_16 = arith.constant 0 : index
      %16 = vector.load %arg5[%c0_15, %c0_16] : memref<1x128xf32, #tpu.memory_space<vmem>>, vector<1x128xf32>
      %17 = vector.broadcast %16 : vector<1x128xf32> to vector<128x128xf32>
      %18 = arith.addf %15, %17 : vector<128x128xf32>
      %cst_17 = arith.constant 0.000000e+00 : f32
      %19 = vector.broadcast %cst_17 : f32 to vector<128x128xf32>
      %20 = arith.maximumf %18, %19 : vector<128x128xf32>
      %21 = arith.truncf %20 : vector<128x128xf32> to vector<128x128xbf16>
      %c0_18 = arith.constant 0 : index
      %c0_19 = arith.constant 0 : index
      %22 = vector.load %arg6[%c0_18, %c0_19] : memref<128x128xbf16, #tpu.memory_space<vmem>>, vector<128x128xbf16>
      %cst_20 = arith.constant dense<0.000000e+00> : vector<128x128xf32>
      %23 = tpu.matmul %21, %22, %cst_20 {dimension_numbers = #tpu.dot_dimension_numbers<[1], [0], [0], [1], [0, 0, 1, 1], [], []>} : vector<128x128xbf16>, vector<128x128xbf16>, vector<128x128xf32> -> vector<128x128xf32>
      %c0_21 = arith.constant 0 : index
      %c0_22 = arith.constant 0 : index
      %24 = vector.load %arg7[%c0_21, %c0_22] : memref<1x128xf32, #tpu.memory_space<vmem>>, vector<1x128xf32>
      %25 = vector.broadcast %24 : vector<1x128xf32> to vector<128x128xf32>
      %26 = arith.addf %23, %25 : vector<128x128xf32>
      %cst_23 = arith.constant 0.000000e+00 : f32
      %27 = vector.broadcast %cst_23 : f32 to vector<128x128xf32>
      %28 = arith.maximumf %26, %27 : vector<128x128xf32>
      %29 = arith.truncf %28 : vector<128x128xf32> to vector<128x128xbf16>
      %c0_24 = arith.constant 0 : index
      %c0_25 = arith.constant 0 : index
      %30 = vector.load %arg8[%c0_24, %c0_25] : memref<128x128xbf16, #tpu.memory_space<vmem>>, vector<128x128xbf16>
      tpu.vector_store %arg8[%c0_24, %c0_25], %29 {strides = array<i32>} : memref<128x128xbf16, #tpu.memory_space<vmem>>, vector<128x128xbf16>,
    } else {
    }
    return
  }
  func.func @transform_0(%arg0: i32, %arg1: i32) -> (i32, i32) {
    %c0_i32 = arith.constant 0 : i32
    return %arg0, %arg1 : i32, i32
  }
  func.func @transform_1(%arg0: i32, %arg1: i32) -> (i32, i32) {
    %c0_i32 = arith.constant 0 : i32
    %c0_i32_0 = arith.constant 0 : i32
    %c0_i32_1 = arith.constant 0 : i32
    return %c0_i32, %c0_i32_0 : i32, i32
  }
  func.func @transform_2(%arg0: i32, %arg1: i32) -> (i32, i32) {
    %c0_i32 = arith.constant 0 : i32
    %c0_i32_0 = arith.constant 0 : i32
    %c0_i32_1 = arith.constant 0 : i32
    return %c0_i32, %c0_i32_0 : i32, i32
  }
  func.func @transform_3(%arg0: i32, %arg1: i32) -> (i32, i32) {
    %c0_i32 = arith.constant 0 : i32
    %c0_i32_0 = arith.constant 0 : i32
    %c0_i32_1 = arith.constant 0 : i32
    return %c0_i32, %c0_i32_0 : i32, i32
  }
  func.func @transform_4(%arg0: i32, %arg1: i32) -> (i32, i32) {
    %c0_i32 = arith.constant 0 : i32
    %c0_i32_0 = arith.constant 0 : i32
    %c0_i32_1 = arith.constant 0 : i32
    return %c0_i32, %c0_i32_0 : i32, i32
  }
  func.func @transform_5(%arg0: i32, %arg1: i32) -> (i32, i32) {
    %c0_i32 = arith.constant 0 : i32
    %c0_i32_0 = arith.constant 0 : i32
    %c0_i32_1 = arith.constant 0 : i32
    return %c0_i32, %c0_i32_0 : i32, i32
  }
  func.func @transform_6(%arg0: i32, %arg1: i32) -> (i32, i32) {
    %c0_i32 = arith.constant 0 : i32
    %c0_i32_0 = arith.constant 0 : i32
    return %arg0, %c0_i32 : i32, i32
  }
}

module attributes {stable_mosaic.version = 11 : i64} {
  func.func @_linear_kernel(%arg0: i32, %arg1: memref<128x128xbf16, #tpu.memory_space<vmem>>, %arg2: memref<128x128xbf16, #tpu.memory_space<vmem>>, %arg3: memref<1x128xf32, #tpu.memory_space<vmem>>, %arg4: memref<128x128xbf16, #tpu.memory_space<vmem>>) attributes {dimension_semantics = [#tpu.dimension_semantics<parallel>], iteration_bounds = array<i64: 1>, scalar_prefetch = 0 : i64, scratch_operands = 0 : i64, tpu.core_type = #tpu.core_type<tc>, window_params = [{transform_indices = @transform_0, window_bounds = array<i64: 128, 128>}, {pipeline_mode = #tpu.pipeline_mode<synchronous>, transform_indices = @transform_1, window_bounds = array<i64: 128, 128>}, {pipeline_mode = #tpu.pipeline_mode<synchronous>, transform_indices = @transform_2, window_bounds = array<i64: 1, 128>}, {transform_indices = @transform_3, window_bounds = array<i64: 128, 128>}]} {
    %c0 = arith.constant 0 : index
    %c0_0 = arith.constant 0 : index
    %0 = vector.load %arg1[%c0, %c0_0] : memref<128x128xbf16, #tpu.memory_space<vmem>>, vector<128x128xbf16>
    %c0_1 = arith.constant 0 : index
    %c0_2 = arith.constant 0 : index
    %1 = vector.load %arg2[%c0_1, %c0_2] : memref<128x128xbf16, #tpu.memory_space<vmem>>, vector<128x128xbf16>
    %cst = arith.constant dense<0.000000e+00> : vector<128x128xf32>
    %2 = tpu.matmul %0, %1, %cst {dimension_numbers = #tpu.dot_dimension_numbers<[1], [0], [0], [1], [0, 0, 1, 1], [], []>} : vector<128x128xbf16>, vector<128x128xbf16>, vector<128x128xf32> -> vector<128x128xf32>
    %c0_3 = arith.constant 0 : index
    %c0_4 = arith.constant 0 : index
    %3 = vector.load %arg3[%c0_3, %c0_4] : memref<1x128xf32, #tpu.memory_space<vmem>>, vector<1x128xf32>
    %4 = vector.broadcast %3 : vector<1x128xf32> to vector<128x128xf32>
    %5 = arith.addf %2, %4 : vector<128x128xf32>
    %6 = arith.truncf %5 : vector<128x128xf32> to vector<128x128xbf16>
    %c0_5 = arith.constant 0 : index
    %c0_6 = arith.constant 0 : index
    %7 = vector.load %arg4[%c0_5, %c0_6] : memref<128x128xbf16, #tpu.memory_space<vmem>>, vector<128x128xbf16>
    tpu.vector_store %arg4[%c0_5, %c0_6], %6 {strides = array<i32>} : memref<128x128xbf16, #tpu.memory_space<vmem>>, vector<128x128xbf16>,
    return
  }
  func.func @transform_0(%arg0: i32) -> (i32, i32) {
    %c0_i32 = arith.constant 0 : i32
    %c0_i32_0 = arith.constant 0 : i32
    return %arg0, %c0_i32 : i32, i32
  }
  func.func @transform_1(%arg0: i32) -> (i32, i32) {
    %c0_i32 = arith.constant 0 : i32
    %c0_i32_0 = arith.constant 0 : i32
    %c0_i32_1 = arith.constant 0 : i32
    return %c0_i32, %c0_i32_0 : i32, i32
  }
  func.func @transform_2(%arg0: i32) -> (i32, i32) {
    %c0_i32 = arith.constant 0 : i32
    %c0_i32_0 = arith.constant 0 : i32
    %c0_i32_1 = arith.constant 0 : i32
    return %c0_i32, %c0_i32_0 : i32, i32
  }
  func.func @transform_3(%arg0: i32) -> (i32, i32) {
    %c0_i32 = arith.constant 0 : i32
    %c0_i32_0 = arith.constant 0 : i32
    return %arg0, %c0_i32 : i32, i32
  }
}

module attributes {stable_mosaic.version = 11 : i64} {
  func.func @_head_kernel(%arg0: i32, %arg1: memref<8x128xbf16, #tpu.memory_space<vmem>>, %arg2: memref<128x128xbf16, #tpu.memory_space<vmem>>, %arg3: memref<128x128xbf16, #tpu.memory_space<vmem>>, %arg4: memref<1x128xf32, #tpu.memory_space<vmem>>, %arg5: memref<128x4xbf16, #tpu.memory_space<vmem>>, %arg6: memref<1x4xf32, #tpu.memory_space<vmem>>, %arg7: memref<8x4xf32, #tpu.memory_space<vmem>>, %arg8: memref<8x128xf32, #tpu.memory_space<vmem>>) attributes {dimension_semantics = [#tpu.dimension_semantics<arbitrary>], iteration_bounds = array<i64: 1>, scalar_prefetch = 0 : i64, scratch_operands = 1 : i64, tpu.core_type = #tpu.core_type<tc>, window_params = [{transform_indices = @transform_0, window_bounds = array<i64: 8, 128>}, {transform_indices = @transform_1, window_bounds = array<i64: 128, 128>}, {pipeline_mode = #tpu.pipeline_mode<synchronous>, transform_indices = @transform_2, window_bounds = array<i64: 128, 128>}, {pipeline_mode = #tpu.pipeline_mode<synchronous>, transform_indices = @transform_3, window_bounds = array<i64: 1, 128>}, {pipeline_mode = #tpu.pipeline_mode<synchronous>, transform_indices = @transform_4, window_bounds = array<i64: 128, 4>}, {pipeline_mode = #tpu.pipeline_mode<synchronous>, transform_indices = @transform_5, window_bounds = array<i64: 1, 4>}, {pipeline_mode = #tpu.pipeline_mode<synchronous>, transform_indices = @transform_6, window_bounds = array<i64: 8, 4>}]} {
    %c0_i32 = arith.constant 0 : i32
    %0 = arith.cmpi eq, %arg0, %c0_i32 : i32
    %1 = arith.extui %0 : i1 to i32
    %c0_i32_0 = arith.constant 0 : i32
    %2 = arith.cmpi ne, %1, %c0_i32_0 : i32
    scf.if %2 {
      %cst_10 = arith.constant 0.000000e+00 : f32
      %12 = vector.broadcast %cst_10 : f32 to vector<8x128xf32>
      %c0_11 = arith.constant 0 : index
      %c0_12 = arith.constant 0 : index
      %13 = vector.load %arg8[%c0_11, %c0_12] : memref<8x128xf32, #tpu.memory_space<vmem>>, vector<8x128xf32>
      tpu.vector_store %arg8[%c0_11, %c0_12], %12 {strides = array<i32>} : memref<8x128xf32, #tpu.memory_space<vmem>>, vector<8x128xf32>,
    } else {
    }
    %c0 = arith.constant 0 : index
    %c0_1 = arith.constant 0 : index
    %3 = vector.load %arg8[%c0, %c0_1] : memref<8x128xf32, #tpu.memory_space<vmem>>, vector<8x128xf32>
    %c0_2 = arith.constant 0 : index
    %c0_3 = arith.constant 0 : index
    %4 = vector.load %arg1[%c0_2, %c0_3] : memref<8x128xbf16, #tpu.memory_space<vmem>>, vector<8x128xbf16>
    %c0_4 = arith.constant 0 : index
    %c0_5 = arith.constant 0 : index
    %5 = vector.load %arg2[%c0_4, %c0_5] : memref<128x128xbf16, #tpu.memory_space<vmem>>, vector<128x128xbf16>
    %cst = arith.constant dense<0.000000e+00> : vector<8x128xf32>
    %6 = tpu.matmul %4, %5, %cst {dimension_numbers = #tpu.dot_dimension_numbers<[1], [0], [0], [1], [0, 0, 1, 1], [], []>} : vector<8x128xbf16>, vector<128x128xbf16>, vector<8x128xf32> -> vector<8x128xf32>
    %7 = arith.addf %3, %6 : vector<8x128xf32>
    %c0_6 = arith.constant 0 : index
    %c0_7 = arith.constant 0 : index
    %8 = vector.load %arg8[%c0_6, %c0_7] : memref<8x128xf32, #tpu.memory_space<vmem>>, vector<8x128xf32>
    tpu.vector_store %arg8[%c0_6, %c0_7], %7 {strides = array<i32>} : memref<8x128xf32, #tpu.memory_space<vmem>>, vector<8x128xf32>,
    %c0_i32_8 = arith.constant 0 : i32
    %9 = arith.cmpi eq, %arg0, %c0_i32_8 : i32
    %10 = arith.extui %9 : i1 to i32
    %c0_i32_9 = arith.constant 0 : i32
    %11 = arith.cmpi ne, %10, %c0_i32_9 : i32
    scf.if %11 {
      %c0_10 = arith.constant 0 : index
      %c0_11 = arith.constant 0 : index
      %12 = vector.load %arg8[%c0_10, %c0_11] : memref<8x128xf32, #tpu.memory_space<vmem>>, vector<8x128xf32>
      %13 = arith.truncf %12 : vector<8x128xf32> to vector<8x128xbf16>
      %c0_12 = arith.constant 0 : index
      %c0_13 = arith.constant 0 : index
      %14 = vector.load %arg3[%c0_12, %c0_13] : memref<128x128xbf16, #tpu.memory_space<vmem>>, vector<128x128xbf16>
      %cst_14 = arith.constant dense<0.000000e+00> : vector<8x128xf32>
      %15 = tpu.matmul %13, %14, %cst_14 {dimension_numbers = #tpu.dot_dimension_numbers<[1], [0], [0], [1], [0, 0, 1, 1], [], []>} : vector<8x128xbf16>, vector<128x128xbf16>, vector<8x128xf32> -> vector<8x128xf32>
      %c0_15 = arith.constant 0 : index
      %c0_16 = arith.constant 0 : index
      %16 = vector.load %arg4[%c0_15, %c0_16] : memref<1x128xf32, #tpu.memory_space<vmem>>, vector<1x128xf32>
      %17 = vector.broadcast %16 : vector<1x128xf32> to vector<8x128xf32>
      %18 = arith.addf %15, %17 : vector<8x128xf32>
      %cst_17 = arith.constant 0.000000e+00 : f32
      %19 = vector.broadcast %cst_17 : f32 to vector<8x128xf32>
      %20 = arith.maximumf %18, %19 : vector<8x128xf32>
      %21 = arith.truncf %20 : vector<8x128xf32> to vector<8x128xbf16>
      %c0_18 = arith.constant 0 : index
      %c0_19 = arith.constant 0 : index
      %22 = vector.load %arg5[%c0_18, %c0_19] : memref<128x4xbf16, #tpu.memory_space<vmem>>, vector<128x4xbf16>
      %cst_20 = arith.constant dense<0.000000e+00> : vector<8x4xf32>
      %23 = tpu.matmul %21, %22, %cst_20 {dimension_numbers = #tpu.dot_dimension_numbers<[1], [0], [0], [1], [0, 0, 1, 1], [], []>} : vector<8x128xbf16>, vector<128x4xbf16>, vector<8x4xf32> -> vector<8x4xf32>
      %c0_21 = arith.constant 0 : index
      %c0_22 = arith.constant 0 : index
      %24 = vector.load %arg6[%c0_21, %c0_22] : memref<1x4xf32, #tpu.memory_space<vmem>>, vector<1x4xf32>
      %25 = vector.broadcast %24 : vector<1x4xf32> to vector<8x4xf32>
      %26 = arith.addf %23, %25 : vector<8x4xf32>
      %cst_23 = arith.constant dense<0xFF800000> : vector<8xf32>
      %27 = vector.multi_reduction <maximumf>, %26, %cst_23 [1] : vector<8x4xf32> to vector<8xf32>
      %28 = vector.shape_cast %27 : vector<8xf32> to vector<8x1xf32>
      %29 = vector.broadcast %28 : vector<8x1xf32> to vector<8x4xf32>
      %30 = arith.subf %26, %29 : vector<8x4xf32>
      %31 = math.exp %30 : vector<8x4xf32>
      %cst_24 = arith.constant dense<0.000000e+00> : vector<8xf32>
      %32 = vector.multi_reduction <add>, %31, %cst_24 [1] : vector<8x4xf32> to vector<8xf32>
      %33 = vector.shape_cast %32 : vector<8xf32> to vector<8x1xf32>
      %34 = math.log %33 : vector<8x1xf32>
      %35 = vector.broadcast %34 : vector<8x1xf32> to vector<8x4xf32>
      %36 = arith.subf %30, %35 : vector<8x4xf32>
      %c0_25 = arith.constant 0 : index
      %c0_26 = arith.constant 0 : index
      %37 = vector.load %arg7[%c0_25, %c0_26] : memref<8x4xf32, #tpu.memory_space<vmem>>, vector<8x4xf32>
      tpu.vector_store %arg7[%c0_25, %c0_26], %36 {strides = array<i32>} : memref<8x4xf32, #tpu.memory_space<vmem>>, vector<8x4xf32>,
    } else {
    }
    return
  }
  func.func @transform_0(%arg0: i32) -> (i32, i32) {
    %c0_i32 = arith.constant 0 : i32
    %c0_i32_0 = arith.constant 0 : i32
    return %c0_i32, %arg0 : i32, i32
  }
  func.func @transform_1(%arg0: i32) -> (i32, i32) {
    %c0_i32 = arith.constant 0 : i32
    %c0_i32_0 = arith.constant 0 : i32
    return %arg0, %c0_i32 : i32, i32
  }
  func.func @transform_2(%arg0: i32) -> (i32, i32) {
    %c0_i32 = arith.constant 0 : i32
    %c0_i32_0 = arith.constant 0 : i32
    %c0_i32_1 = arith.constant 0 : i32
    return %c0_i32, %c0_i32_0 : i32, i32
  }
  func.func @transform_3(%arg0: i32) -> (i32, i32) {
    %c0_i32 = arith.constant 0 : i32
    %c0_i32_0 = arith.constant 0 : i32
    %c0_i32_1 = arith.constant 0 : i32
    return %c0_i32, %c0_i32_0 : i32, i32
  }
  func.func @transform_4(%arg0: i32) -> (i32, i32) {
    %c0_i32 = arith.constant 0 : i32
    %c0_i32_0 = arith.constant 0 : i32
    %c0_i32_1 = arith.constant 0 : i32
    return %c0_i32, %c0_i32_0 : i32, i32
  }
  func.func @transform_5(%arg0: i32) -> (i32, i32) {
    %c0_i32 = arith.constant 0 : i32
    %c0_i32_0 = arith.constant 0 : i32
    %c0_i32_1 = arith.constant 0 : i32
    return %c0_i32, %c0_i32_0 : i32, i32
  }
  func.func @transform_6(%arg0: i32) -> (i32, i32) {
    %c0_i32 = arith.constant 0 : i32
    %c0_i32_0 = arith.constant 0 : i32
    %c0_i32_1 = arith.constant 0 : i32
    return %c0_i32, %c0_i32_0 : i32, i32
  }
}

</mosaic_0001>

<bundles_post_ra>
// kernel: server_gin_forward.4
= control target key start
LH: loop header
LB: loop body
LE: loop exit
PB: predicated region body
PF: predicated region fallthrough
CT: control target
= control target key end

     0   :  { %s602_s1 = inlined_call_operand.vmem [shape: bf16[128,128], index: 1, kind: input, shape index: {}]   ;;  %s603_s0 = inlined_call_operand.vmem [shape: bf16[128,128], index: 0, kind: input, shape index: {}]   ;;  %s604_s2 = inlined_call_operand.vmem [shape: f32[1,128], index: 2, kind: input, shape index: {}]   ;;  %s605_s3 = inlined_call_operand.vmem [shape: bf16[128,128], index: 3, kind: output, shape index: {}]  }
   0x1   :  { %v491_v0 = vld [vmem:[%s602_s1] sm:$0xff]   ;;  %v492_v1 = vld [vmem:[%s602_s1 + $0x8] sm:$0xff]   ;;  %v493_v2 = vld [vmem:[%s602_s1 + $0x10] sm:$0xff]  }
   0x2   :  { %443 = vmatprep.subr.bf16.mxu0 %v491_v0  ;;  %475 = vmatprep.subr.bf16.mxu1 %v491_v0  ;;  %v494_v3 = vld [vmem:[%s602_s1 + $0x18] sm:$0xff]   ;;  %v499_v4 = vld [vmem:[%s603_s0] sm:$0xff]   ;;  %v496_v7 = vld [vmem:[%s602_s1 + $0x28] sm:$0xff]  }
   0x3   :  { %444 = vmatpush3.bf16.msra.mxu0 %v491_v0  ;;  %483 = vmatpush3.bf16.msra.mxu1 %v491_v0  ;;  %v500_v5 = vld [vmem:[%s603_s0 + $0x20] sm:$0xff]   ;;  %v497_v8 = vld [vmem:[%s602_s1 + $0x30] sm:$0xff]   ;;  %v498_v9 = vld [vmem:[%s602_s1 + $0x38] sm:$0xff]  }
   0x4   :  { %445 = vmatprep.subr.bf16.mxu0 %v492_v1  ;;  %476 = vmatprep.subr.bf16.mxu1 %v492_v1  ;;  %v495_v6 = vld [vmem:[%s602_s1 + $0x20] sm:$0xff]   ;;  %v501_v10 = vld [vmem:[%s603_s0 + $0x8] sm:$0xff]   ;;  %v503_v12 = vld [vmem:[%s603_s0 + $0x10] sm:$0xff]  }
   0x5   :  { %459 = vmatprep.mubr.bf16.mxu0 %v499_v4  ;;  %467 = vmatprep.mubr.bf16.mxu1 %v500_v5  ;;  %v502_v11 = vld [vmem:[%s603_s0 + $0x28] sm:$0xff]   ;;  %v504_v13 = vld [vmem:[%s603_s0 + $0x30] sm:$0xff]   ;;  %v505_v14 = vld [vmem:[%s603_s0 + $0x18] sm:$0xff]  }
   0x6   :  { %v506_v15 = vld [vmem:[%s603_s0 + $0x38] sm:$0xff]   ;;  %v331_v17 = vld [vmem:[%s604_s2] ss:$0 sm:$0xff] }
   0x7   :  { %446 = vmatpush3.bf16.msra.mxu0 %v492_v1  ;;  %484 = vmatpush3.bf16.msra.mxu1 %v492_v1 }
   0x8   :  { %447 = vmatprep.subr.bf16.mxu0 %v493_v2  ;;  %477 = vmatprep.subr.bf16.mxu1 %v493_v2 }
   0xb   :  { %448 = vmatpush3.bf16.msra.mxu0 %v493_v2  ;;  %485 = vmatpush3.bf16.msra.mxu1 %v493_v2 }
   0xc   :  { %449 = vmatprep.subr.bf16.mxu0 %v494_v3  ;;  %478 = vmatprep.subr.bf16.mxu1 %v494_v3 }
   0xf   :  { %450 = vmatpush3.bf16.msra.mxu0 %v494_v3  ;;  %486 = vmatpush3.bf16.msra.mxu1 %v494_v3 }
  0x10   :  { %451 = vmatprep.subr.bf16.mxu0 %v495_v6  ;;  %479 = vmatprep.subr.bf16.mxu1 %v495_v6 }
  0x13   :  { %452 = vmatpush3.bf16.msra.mxu0 %v495_v6  ;;  %487 = vmatpush3.bf16.msra.mxu1 %v495_v6 }
  0x14   :  { %453 = vmatprep.subr.bf16.mxu0 %v496_v7  ;;  %480 = vmatprep.subr.bf16.mxu1 %v496_v7 }
  0x17   :  { %454 = vmatpush3.bf16.msra.mxu0 %v496_v7  ;;  %488 = vmatpush3.bf16.msra.mxu1 %v496_v7 }
  0x18   :  { %455 = vmatprep.subr.bf16.mxu0 %v497_v8  ;;  %481 = vmatprep.subr.bf16.mxu1 %v497_v8 }
  0x1b   :  { %456 = vmatpush3.bf16.msra.mxu0 %v497_v8  ;;  %489 = vmatpush3.bf16.msra.mxu1 %v497_v8 }
  0x1c   :  { %457 = vmatprep.subr.bf16.mxu0 %v498_v9  ;;  %482 = vmatprep.subr.bf16.mxu1 %v498_v9 }
  0x1f   :  { %458 = vmatpush3.bf16.msra.mxu0 %v498_v9  ;;  %490 = vmatpush3.bf16.msra.mxu1 %v498_v9 }
  0x22   :  { %460 = vmatmul.mubr.bf16.vlgmr.msra.gmra.mrb[0].mxu0 %v501_v10  ;;  %468 = vmatmul.mubr.bf16.vlgmr.msra.gmra.mrb[0].mxu1 %v502_v11 }
  0x23   :  { %463 = vmatprep.mubr.bf16.mxu0 %v503_v12  ;;  %471 = vmatprep.mubr.bf16.mxu1 %v504_v13 }
  0x2a   :  { %464 = vmatmul.mubr.bf16.gmra.mrb[4].mxu0 %v505_v14  ;;  %472 = vmatmul.mubr.bf16.gmra.mrb[4].mxu1 %v506_v15 }
  0xf5   :  { %v461_v16 = vpop.f32.mrb[0].mxu0  ;;  %v469_v18 = vpop.f32.mrb[0].mxu1 }
  0xf6   :  { %v184_v19 = vpop.f32.mrb[1].mxu0  ;;  %v216_v20 = vpop.f32.mrb[1].mxu1  ;;  %v193_v23 = vadd.f32 %v461_v16, %v331_v17  ;;  %v225_v24 = vadd.f32 %v469_v18, %v331_v17 }
  0xf7   :  { %v462_v21 = vpop.f32.mrb[2].mxu0  ;;  %v470_v22 = vpop.f32.mrb[2].mxu1  ;;  %v185_v29 = vadd.f32 %v331_v17, %v184_v19  ;;  %v217_v30 = vadd.f32 %v331_v17, %v216_v20 }
  0xf8   :  { %v196_v25 = vadd.f32 %v462_v21, %v331_v17  ;;  %v228_v26 = vadd.f32 %v470_v22, %v331_v17  ;;  %v187_v27 = vpop.f32.mrb[3].mxu0  ;;  %v219_v28 = vpop.f32.mrb[3].mxu1 }
  0xf9   :  { %v188_v31 = vadd.f32 %v331_v17, %v187_v27  ;;  %v220_v32 = vadd.f32 %v331_v17, %v219_v28 }
  0xfa   :  { %v388_v33 = vpack.c.bf16 %v196_v25, %v193_v23  ;;  %v408_v34 = vpack.c.bf16 %v228_v26, %v225_v24 }
  0xfb   :  { %v383_v35 = vpack.c.bf16 %v188_v31, %v185_v29  ;;  %v403_v36 = vpack.c.bf16 %v220_v32, %v217_v30 }
  0xfc   :  { %420 = vst [vmem:[%s605_s3 + $0x8] sm:$0xff] %v388_v33   ;;  %424 = vst [vmem:[%s605_s3 + $0x28] sm:$0xff] %v408_v34  }
  0xfd   :  { %384 = vst [vmem:[%s605_s3] sm:$0xff] %v383_v35   ;;  %423 = vst [vmem:[%s605_s3 + $0x20] sm:$0xff] %v403_v36   ;;  %v465_v37 = vpop.f32.mrb[4].mxu0  ;;  %v473_v38 = vpop.f32.mrb[4].mxu1 }
  0xfe   :  { %v200_v39 = vpop.f32.mrb[5].mxu0  ;;  %v232_v40 = vpop.f32.mrb[5].mxu1  ;;  %v209_v43 = vadd.f32 %v465_v37, %v331_v17  ;;  %v241_v44 = vadd.f32 %v473_v38, %v331_v17 }
  0xff   :  { %v466_v41 = vpop.f32.mrb[6].mxu0  ;;  %v474_v42 = vpop.f32.mrb[6].mxu1  ;;  %v201_v49 = vadd.f32 %v331_v17, %v200_v39  ;;  %v233_v50 = vadd.f32 %v331_v17, %v232_v40 }
 0x100   :  { %v212_v45 = vadd.f32 %v466_v41, %v331_v17  ;;  %v244_v46 = vadd.f32 %v474_v42, %v331_v17  ;;  %v203_v47 = vpop.f32.mrb[7].mxu0  ;;  %v235_v48 = vpop.f32.mrb[7].mxu1 }
 0x101   :  { %v204_v51 = vadd.f32 %v331_v17, %v203_v47  ;;  %v236_v52 = vadd.f32 %v331_v17, %v235_v48 }
 0x102   :  { %v398_v53 = vpack.c.bf16 %v212_v45, %v209_v43  ;;  %v418_v54 = vpack.c.bf16 %v244_v46, %v241_v44 }
 0x103   :  { %v393_v55 = vpack.c.bf16 %v204_v51, %v201_v49  ;;  %v413_v56 = vpack.c.bf16 %v236_v52, %v233_v50 }
 0x104   :  { %422 = vst [vmem:[%s605_s3 + $0x18] sm:$0xff] %v398_v53   ;;  %426 = vst [vmem:[%s605_s3 + $0x38] sm:$0xff] %v418_v54  }
 0x105   :  { %421 = vst [vmem:[%s605_s3 + $0x10] sm:$0xff] %v393_v55   ;;  %425 = vst [vmem:[%s605_s3 + $0x30] sm:$0xff] %v413_v56  }

// kernel: server_gin_forward.5
= control target key start
LH: loop header
LB: loop body
LE: loop exit
PB: predicated region body
PF: predicated region fallthrough
CT: control target
= control target key end

     0   :  { %s1270_s1 = inlined_call_operand.vmem [shape: bf16[128,128], index: 1, kind: input, shape index: {}]   ;;  %s1271_s0 = inlined_call_operand.vmem [shape: bf16[128,128], index: 0, kind: input, shape index: {}]   ;;  %s1272_s2 = inlined_call_operand.vmem [shape: bf16[128,128], index: 2, kind: input, shape index: {}]   ;;  %s1273_s4 = inlined_call_operand.vmem [shape: bf16[128,128], index: 4, kind: input, shape index: {}]   ;;  %s1274_s3 = inlined_call_operand.vmem [shape: f32[1,128], index: 3, kind: input, shape index: {}]   ;;  %s1275_s5 = inlined_call_operand.vmem [shape: f32[1,128], index: 5, kind: input, shape index: {}]   ;;  %s1276_s6 = inlined_call_operand.vmem [shape: bf16[128,128], index: 6, kind: output, shape index: {}]  }
   0x1   :  { %v1077_v0 = vld [vmem:[%s1270_s1] sm:$0xff]   ;;  %v1078_v1 = vld [vmem:[%s1270_s1 + $0x8] sm:$0xff]   ;;  %v1079_v2 = vld [vmem:[%s1270_s1 + $0x10] sm:$0xff]  }
   0x2   :  { %965 = vmatprep.subr.bf16.mxu0 %v1077_v0  ;;  %v1080_v3 = vld [vmem:[%s1270_s1 + $0x18] sm:$0xff]   ;;  %v1085_v4 = vld [vmem:[%s1271_s0] sm:$0xff]   ;;  %v1082_v6 = vld [vmem:[%s1270_s1 + $0x28] sm:$0xff]  }
   0x3   :  { %966 = vmatpush3.bf16.msra.mxu0 %v1077_v0  ;;  %981 = vmatprep.mubr.bf16.mxu0 %v1085_v4  ;;  %v1081_v5 = vld [vmem:[%s1270_s1 + $0x20] sm:$0xff]   ;;  %v1094_v8 = vld [vmem:[%s1272_s2 + $0x8] sm:$0xff]   ;;  %v1083_v9 = vld [vmem:[%s1270_s1 + $0x30] sm:$0xff]  }
   0x4   :  { %967 = vmatprep.subr.bf16.mxu0 %v1078_v1  ;;  %v1093_v7 = vld [vmem:[%s1272_s2] sm:$0xff]   ;;  %v1095_v10 = vld [vmem:[%s1272_s2 + $0x10] sm:$0xff]   ;;  %v1084_v11 = vld [vmem:[%s1270_s1 + $0x38] sm:$0xff]  }
   0x5   :  { %997 = vmatprep.subr.bf16.mxu1 %v1093_v7  ;;  %v1096_v12 = vld [vmem:[%s1272_s2 + $0x18] sm:$0xff]   ;;  %v1097_v13 = vld [vmem:[%s1272_s2 + $0x20] sm:$0xff]   ;;  %v1086_v14 = vld [vmem:[%s1271_s0 + $0x8] sm:$0xff]  }
   0x6   :  { %998 = vmatpush3.bf16.msra.mxu1 %v1093_v7  ;;  %v1087_v15 = vld [vmem:[%s1271_s0 + $0x10] sm:$0xff]   ;;  %v1098_v16 = vld [vmem:[%s1272_s2 + $0x28] sm:$0xff]   ;;  %v1088_v18 = vld [vmem:[%s1271_s0 + $0x18] sm:$0xff]  }
   0x7   :  { %968 = vmatpush3.bf16.msra.mxu0 %v1078_v1  ;;  %999 = vmatprep.subr.bf16.mxu1 %v1094_v8  ;;  %v1099_v17 = vld [vmem:[%s1272_s2 + $0x30] sm:$0xff]   ;;  %v1089_v19 = vld [vmem:[%s1271_s0 + $0x20] sm:$0xff]   ;;  %v1090_v20 = vld [vmem:[%s1271_s0 + $0x28] sm:$0xff]  }
   0x8   :  { %969 = vmatprep.subr.bf16.mxu0 %v1079_v2  ;;  %v1091_v21 = vld [vmem:[%s1271_s0 + $0x30] sm:$0xff]   ;;  %v1092_v22 = vld [vmem:[%s1271_s0 + $0x38] sm:$0xff]   ;;  %v1101_v24 = vld [vmem:[%s1273_s4] sm:$0xff]  }
   0x9   :  { %v1100_v23 = vld [vmem:[%s1272_s2 + $0x38] sm:$0xff]   ;;  %v1102_v25 = vld [vmem:[%s1273_s4 + $0x8] sm:$0xff]   ;;  %v1103_v26 = vld [vmem:[%s1273_s4 + $0x10] sm:$0xff]  }
   0xa   :  { %1000 = vmatpush3.bf16.msra.mxu1 %v1094_v8  ;;  %v1104_v27 = vld [vmem:[%s1273_s4 + $0x18] sm:$0xff]   ;;  %v1105_v28 = vld [vmem:[%s1273_s4 + $0x20] sm:$0xff]   ;;  %v1106_v29 = vld [vmem:[%s1273_s4 + $0x28] sm:$0xff]  }
   0xb   :  { %970 = vmatpush3.bf16.msra.mxu0 %v1079_v2  ;;  %1001 = vmatprep.subr.bf16.mxu1 %v1095_v10  ;;  %v1107_v54 = vld [vmem:[%s1273_s4 + $0x30] sm:$0xff]   ;;  %v1108_v55 = vld [vmem:[%s1273_s4 + $0x38] sm:$0xff]   ;;  %v820_v56 = vld [vmem:[%s1274_s3] ss:$0 sm:$0xff] }
   0xc   :  { %971 = vmatprep.subr.bf16.mxu0 %v1080_v3 }
   0xe   :  { %1002 = vmatpush3.bf16.msra.mxu1 %v1095_v10 }
   0xf   :  { %972 = vmatpush3.bf16.msra.mxu0 %v1080_v3  ;;  %1003 = vmatprep.subr.bf16.mxu1 %v1096_v12 }
  0x10   :  { %973 = vmatprep.subr.bf16.mxu0 %v1081_v5 }
  0x12   :  { %1004 = vmatpush3.bf16.msra.mxu1 %v1096_v12 }
  0x13   :  { %974 = vmatpush3.bf16.msra.mxu0 %v1081_v5  ;;  %1005 = vmatprep.subr.bf16.mxu1 %v1097_v13 }
  0x14   :  { %975 = vmatprep.subr.bf16.mxu0 %v1082_v6 }
  0x16   :  { %1006 = vmatpush3.bf16.msra.mxu1 %v1097_v13 }
  0x17   :  { %976 = vmatpush3.bf16.msra.mxu0 %v1082_v6  ;;  %1007 = vmatprep.subr.bf16.mxu1 %v1098_v16 }
  0x18   :  { %977 = vmatprep.subr.bf16.mxu0 %v1083_v9 }
  0x1a   :  { %1008 = vmatpush3.bf16.msra.mxu1 %v1098_v16 }
  0x1b   :  { %978 = vmatpush3.bf16.msra.mxu0 %v1083_v9  ;;  %1009 = vmatprep.subr.bf16.mxu1 %v1099_v17 }
  0x1c   :  { %979 = vmatprep.subr.bf16.mxu0 %v1084_v11 }
  0x1e   :  { %1010 = vmatpush3.bf16.msra.mxu1 %v1099_v17 }
  0x1f   :  { %980 = vmatpush3.bf16.msra.mxu0 %v1084_v11  ;;  %1011 = vmatprep.subr.bf16.mxu1 %v1100_v23 }
  0x20   :  { %1029 = vmatprep.subr.bf16.mxu0 %v1101_v24 }
  0x22   :  { %982 = vmatmul.mubr.bf16.vlgmr.msra.gmra.mrb[0].mxu0 %v1086_v14  ;;  %1012 = vmatpush3.bf16.msra.mxu1 %v1100_v23 }
  0x23   :  { %985 = vmatprep.mubr.bf16.mxu0 %v1087_v15  ;;  %1061 = vmatprep.subr.bf16.mxu1 %v1101_v24 }
  0x24   :  { %1030 = vmatpush3.bf16.msra.mxu0 %v1101_v24 }
  0x25   :  { %1031 = vmatprep.subr.bf16.mxu0 %v1102_v25 }
  0x28   :  { %1032 = vmatpush3.bf16.msra.mxu0 %v1102_v25 }
  0x29   :  { %1033 = vmatprep.subr.bf16.mxu0 %v1103_v26 }
  0x2a   :  { %986 = vmatmul.mubr.bf16.gmra.mrb[4].mxu0 %v1088_v18 }
  0x2b   :  { %989 = vmatprep.mubr.bf16.mxu0 %v1089_v19 }
  0x2c   :  { %1034 = vmatpush3.bf16.msra.mxu0 %v1103_v26 }
  0x2d   :  { %1035 = vmatprep.subr.bf16.mxu0 %v1104_v27 }
  0x30   :  { %1036 = vmatpush3.bf16.msra.mxu0 %v1104_v27 }
  0x31   :  { %1037 = vmatprep.subr.bf16.mxu0 %v1105_v28 }
  0x32   :  { %990 = vmatmul.mubr.bf16.gmra.mrb[8].mxu0 %v1090_v20 }
  0x33   :  { %993 = vmatprep.mubr.bf16.mxu0 %v1091_v21 }
  0x34   :  { %1038 = vmatpush3.bf16.msra.mxu0 %v1105_v28 }
  0x35   :  { %1039 = vmatprep.subr.bf16.mxu0 %v1106_v29 }
  0x38   :  { %1040 = vmatpush3.bf16.msra.mxu0 %v1106_v29 }
  0x39   :  { %1041 = vmatprep.subr.bf16.mxu0 %v1107_v54 }
  0x3a   :  { %994 = vmatmul.mubr.bf16.gmra.mrb[12].mxu0 %v1092_v22 }
  0x3c   :  { %1042 = vmatpush3.bf16.msra.mxu0 %v1107_v54 }
  0x3d   :  { %1043 = vmatprep.subr.bf16.mxu0 %v1108_v55 }
  0x40   :  { %1044 = vmatpush3.bf16.msra.mxu0 %v1108_v55 }
  0xf5   :  { %v983_v30 = vpop.f32.mrb[0].mxu0 }
  0xf6   :  { %v222_v31 = vpop.f32.mrb[1].mxu0 }
  0xf7   :  { %v984_v32 = vpop.f32.mrb[2].mxu0 }
  0xf8   :  { %v337_v33 = vpack.c.bf16 %v984_v32, %v983_v30  ;;  %v225_v34 = vpop.f32.mrb[3].mxu0 }
  0xf9   :  { %v336_v35 = vpack.c.bf16 %v225_v34, %v222_v31 }
  0xfb   :  { %1013 = vmatprep.mubr.bf16.mxu1 %v336_v35 }
  0xfc   :  { %1014 = vmatmul.mubr.bf16.vlgmr.msra.gmra.mrb[0].mxu1 %v337_v33 }
  0xfd   :  { %v987_v36 = vpop.f32.mrb[4].mxu0  ;;  %1069 = vmatpush3.bf16.msra.mxu1 %v1101_v24 }
  0xfe   :  { %v238_v37 = vpop.f32.mrb[5].mxu0  ;;  %1062 = vmatprep.subr.bf16.mxu1 %v1102_v25 }
  0xff   :  { %v988_v38 = vpop.f32.mrb[6].mxu0 }
 0x100   :  { %v339_v39 = vpack.c.bf16 %v988_v38, %v987_v36  ;;  %v241_v40 = vpop.f32.mrb[7].mxu0 }
 0x101   :  { %v338_v41 = vpack.c.bf16 %v241_v40, %v238_v37  ;;  %1070 = vmatpush3.bf16.msra.mxu1 %v1102_v25 }
 0x102   :  { %1063 = vmatprep.subr.bf16.mxu1 %v1103_v26 }
 0x103   :  { %1017 = vmatprep.mubr.bf16.mxu1 %v338_v41 }
 0x104   :  { %1018 = vmatmul.mubr.bf16.gmra.mrb[4].mxu1 %v339_v39 }
 0x105   :  { %v991_v42 = vpop.f32.mrb[8].mxu0  ;;  %1071 = vmatpush3.bf16.msra.mxu1 %v1103_v26 }
 0x106   :  { %v254_v43 = vpop.f32.mrb[9].mxu0  ;;  %1064 = vmatprep.subr.bf16.mxu1 %v1104_v27 }
 0x107   :  { %v992_v44 = vpop.f32.mrb[10].mxu0 }
 0x108   :  { %v341_v45 = vpack.c.bf16 %v992_v44, %v991_v42  ;;  %v257_v46 = vpop.f32.mrb[11].mxu0 }
 0x109   :  { %v340_v47 = vpack.c.bf16 %v257_v46, %v254_v43  ;;  %1072 = vmatpush3.bf16.msra.mxu1 %v1104_v27 }
 0x10a   :  { %1065 = vmatprep.subr.bf16.mxu1 %v1105_v28 }
 0x10b   :  { %1021 = vmatprep.mubr.bf16.mxu1 %v340_v47 }
 0x10c   :  { %1022 = vmatmul.mubr.bf16.gmra.mrb[8].mxu1 %v341_v45 }
 0x10d   :  { %v995_v48 = vpop.f32.mrb[12].mxu0  ;;  %1073 = vmatpush3.bf16.msra.mxu1 %v1105_v28 }
 0x10e   :  { %v270_v49 = vpop.f32.mrb[13].mxu0  ;;  %1066 = vmatprep.subr.bf16.mxu1 %v1106_v29 }
 0x10f   :  { %v996_v50 = vpop.f32.mrb[14].mxu0 }
 0x110   :  { %v343_v51 = vpack.c.bf16 %v996_v50, %v995_v48  ;;  %v273_v52 = vpop.f32.mrb[15].mxu0 }
 0x111   :  { %v342_v53 = vpack.c.bf16 %v273_v52, %v270_v49  ;;  %1074 = vmatpush3.bf16.msra.mxu1 %v1106_v29  ;;  %v829_v49 = vld [vmem:[%s1275_s5] ss:$0 sm:$0xff] }
 0x112   :  { %1067 = vmatprep.subr.bf16.mxu1 %v1107_v54 }
 0x113   :  { %1025 = vmatprep.mubr.bf16.mxu1 %v342_v53 }
 0x114   :  { %1026 = vmatmul.mubr.bf16.gmra.mrb[12].mxu1 %v343_v51 }
 0x115   :  { %1075 = vmatpush3.bf16.msra.mxu1 %v1107_v54 }
 0x116   :  { %1068 = vmatprep.subr.bf16.mxu1 %v1108_v55 }
 0x119   :  { %1076 = vmatpush3.bf16.msra.mxu1 %v1108_v55 }
 0x1cf   :  { %v1015_v57 = vpop.f32.mrb[0].mxu1 }
 0x1d0   :  { %v458_v58 = vadd.f32 %v1015_v57, %v820_v56  ;;  %v449_v59 = vpop.f32.mrb[1].mxu1 }
 0x1d1   :  { %v450_v60 = vadd.f32 %v820_v56, %v449_v59  ;;  %v1016_v61 = vpop.f32.mrb[2].mxu1 }
 0x1d2   :  { %v461_v62 = vadd.f32 %v1016_v61, %v820_v56  ;;  %v452_v63 = vpop.f32.mrb[3].mxu1  ;;  %v514_v1 = vmax.f32 %v458_v58, 0.0 }
 0x1d3   :  { %v453_v0 = vadd.f32 %v820_v56, %v452_v63  ;;  %v512_v3 = vmax.f32 %v450_v60, 0.0 }
 0x1d4   :  { %v515_v2 = vmax.f32 %v461_v62, 0.0 }
 0x1d5   :  { %v513_v4 = vmax.f32 %v453_v0, 0.0 }
 0x1d6   :  { %v529_v5 = vpack.c.bf16 %v515_v2, %v514_v1 }
 0x1d7   :  { %v528_v6 = vpack.c.bf16 %v513_v4, %v512_v3  ;;  %v1019_v7 = vpop.f32.mrb[4].mxu1 }
 0x1d8   :  { %v474_v8 = vadd.f32 %v1019_v7, %v820_v56  ;;  %v465_v9 = vpop.f32.mrb[5].mxu1 }
 0x1d9   :  { %v466_v10 = vadd.f32 %v820_v56, %v465_v9  ;;  %v1020_v11 = vpop.f32.mrb[6].mxu1  ;;  %1045 = vmatprep.mubr.bf16.mxu0 %v528_v6 }
 0x1da   :  { %v477_v12 = vadd.f32 %v1020_v11, %v820_v56  ;;  %v468_v13 = vpop.f32.mrb[7].mxu1  ;;  %1046 = vmatmul.mubr.bf16.vlgmr.msra.gmra.mrb[16].mxu0 %v529_v5  ;;  %v518_v15 = vmax.f32 %v474_v8, 0.0 }
 0x1db   :  { %v469_v14 = vadd.f32 %v820_v56, %v468_v13  ;;  %v516_v17 = vmax.f32 %v466_v10, 0.0 }
 0x1dc   :  { %v519_v16 = vmax.f32 %v477_v12, 0.0 }
 0x1dd   :  { %v517_v18 = vmax.f32 %v469_v14, 0.0 }
 0x1de   :  { %v531_v19 = vpack.c.bf16 %v519_v16, %v518_v15 }
 0x1df   :  { %v530_v20 = vpack.c.bf16 %v517_v18, %v516_v17  ;;  %v1023_v21 = vpop.f32.mrb[8].mxu1 }
 0x1e0   :  { %v490_v22 = vadd.f32 %v1023_v21, %v820_v56  ;;  %v481_v23 = vpop.f32.mrb[9].mxu1 }
 0x1e1   :  { %v482_v24 = vadd.f32 %v820_v56, %v481_v23  ;;  %v1024_v25 = vpop.f32.mrb[10].mxu1  ;;  %1049 = vmatprep.mubr.bf16.mxu0 %v530_v20 }
 0x1e2   :  { %v493_v26 = vadd.f32 %v1024_v25, %v820_v56  ;;  %v484_v27 = vpop.f32.mrb[11].mxu1  ;;  %1050 = vmatmul.mubr.bf16.gmra.mrb[20].mxu0 %v531_v19  ;;  %v522_v29 = vmax.f32 %v490_v22, 0.0 }
 0x1e3   :  { %v485_v28 = vadd.f32 %v820_v56, %v484_v27  ;;  %v520_v31 = vmax.f32 %v482_v24, 0.0 }
 0x1e4   :  { %v523_v30 = vmax.f32 %v493_v26, 0.0 }
 0x1e5   :  { %v521_v32 = vmax.f32 %v485_v28, 0.0 }
 0x1e6   :  { %v533_v33 = vpack.c.bf16 %v523_v30, %v522_v29 }
 0x1e7   :  { %v532_v34 = vpack.c.bf16 %v521_v32, %v520_v31  ;;  %v1027_v35 = vpop.f32.mrb[12].mxu1 }
 0x1e8   :  { %v506_v36 = vadd.f32 %v1027_v35, %v820_v56  ;;  %v497_v37 = vpop.f32.mrb[13].mxu1 }
 0x1e9   :  { %v498_v38 = vadd.f32 %v820_v56, %v497_v37  ;;  %v1028_v39 = vpop.f32.mrb[14].mxu1  ;;  %1053 = vmatprep.mubr.bf16.mxu1 %v532_v34 }
 0x1ea   :  { %v509_v40 = vadd.f32 %v1028_v39, %v820_v56  ;;  %v500_v41 = vpop.f32.mrb[15].mxu1  ;;  %1054 = vmatmul.mubr.bf16.vlgmr.msra.gmra.mrb[16].mxu1 %v533_v33  ;;  %v526_v43 = vmax.f32 %v506_v36, 0.0 }
 0x1eb   :  { %v501_v42 = vadd.f32 %v820_v56, %v500_v41  ;;  %v524_v45 = vmax.f32 %v498_v38, 0.0 }
 0x1ec   :  { %v527_v44 = vmax.f32 %v509_v40, 0.0 }
 0x1ed   :  { %v525_v46 = vmax.f32 %v501_v42, 0.0 }
 0x1ee   :  { %v535_v47 = vpack.c.bf16 %v527_v44, %v526_v43 }
 0x1ef   :  { %v534_v48 = vpack.c.bf16 %v525_v46, %v524_v45 }
 0x1f1   :  { %1057 = vmatprep.mubr.bf16.mxu1 %v534_v48 }
 0x1f2   :  { %1058 = vmatmul.mubr.bf16.gmra.mrb[20].mxu1 %v535_v47 }
 0x2ad   :  { %v1047_v50 = vpop.f32.mrb[16].mxu0 }
 0x2ae   :  { %v650_v51 = vadd.f32 %v1047_v50, %v829_v49  ;;  %v641_v52 = vpop.f32.mrb[17].mxu0 }
 0x2af   :  { %v642_v53 = vadd.f32 %v829_v49, %v641_v52  ;;  %v1048_v54 = vpop.f32.mrb[18].mxu0 }
 0x2b0   :  { %v653_v55 = vadd.f32 %v1048_v54, %v829_v49  ;;  %v644_v57 = vpop.f32.mrb[19].mxu0  ;;  %v706_v58 = vmax.f32 %v650_v51, 0.0 }
 0x2b1   :  { %v645_v56 = vadd.f32 %v829_v49, %v644_v57  ;;  %v704_v60 = vmax.f32 %v642_v53, 0.0 }
 0x2b2   :  { %v707_v59 = vmax.f32 %v653_v55, 0.0 }
 0x2b3   :  { %v705_v61 = vmax.f32 %v645_v56, 0.0 }
 0x2b4   :  { %v878_v62 = vpack.c.bf16 %v707_v59, %v706_v58 }
 0x2b5   :  { %v873_v63 = vpack.c.bf16 %v705_v61, %v704_v60  ;;  %v1051_v0 = vpop.f32.mrb[20].mxu0 }
 0x2b6   :  { %910 = vst [vmem:[%s1276_s6 + $0x8] sm:$0xff] %v878_v62   ;;  %v666_v1 = vadd.f32 %v1051_v0, %v829_v49  ;;  %v657_v2 = vpop.f32.mrb[21].mxu0 }
 0x2b7   :  { %874 = vst [vmem:[%s1276_s6] sm:$0xff] %v873_v63   ;;  %v658_v3 = vadd.f32 %v829_v49, %v657_v2  ;;  %v1052_v4 = vpop.f32.mrb[22].mxu0 }
 0x2b8   :  { %v669_v5 = vadd.f32 %v1052_v4, %v829_v49  ;;  %v660_v6 = vpop.f32.mrb[23].mxu0  ;;  %v710_v8 = vmax.f32 %v666_v1, 0.0 }
 0x2b9   :  { %v661_v7 = vadd.f32 %v829_v49, %v660_v6  ;;  %v708_v10 = vmax.f32 %v658_v3, 0.0 }
 0x2ba   :  { %v711_v9 = vmax.f32 %v669_v5, 0.0 }
 0x2bb   :  { %v709_v11 = vmax.f32 %v661_v7, 0.0 }
 0x2bc   :  { %v888_v12 = vpack.c.bf16 %v711_v9, %v710_v8 }
 0x2bd   :  { %v883_v13 = vpack.c.bf16 %v709_v11, %v708_v10  ;;  %v1055_v14 = vpop.f32.mrb[16].mxu1 }
 0x2be   :  { %912 = vst [vmem:[%s1276_s6 + $0x18] sm:$0xff] %v888_v12   ;;  %v682_v15 = vadd.f32 %v1055_v14, %v829_v49  ;;  %v673_v16 = vpop.f32.mrb[17].mxu1 }
 0x2bf   :  { %911 = vst [vmem:[%s1276_s6 + $0x10] sm:$0xff] %v883_v13   ;;  %v674_v17 = vadd.f32 %v829_v49, %v673_v16  ;;  %v1056_v18 = vpop.f32.mrb[18].mxu1 }
 0x2c0   :  { %v685_v19 = vadd.f32 %v1056_v18, %v829_v49  ;;  %v676_v20 = vpop.f32.mrb[19].mxu1  ;;  %v714_v22 = vmax.f32 %v682_v15, 0.0 }
 0x2c1   :  { %v677_v21 = vadd.f32 %v829_v49, %v676_v20  ;;  %v712_v24 = vmax.f32 %v674_v17, 0.0 }
 0x2c2   :  { %v715_v23 = vmax.f32 %v685_v19, 0.0 }
 0x2c3   :  { %v713_v25 = vmax.f32 %v677_v21, 0.0 }
 0x2c4   :  { %v898_v26 = vpack.c.bf16 %v715_v23, %v714_v22 }
 0x2c5   :  { %v893_v27 = vpack.c.bf16 %v713_v25, %v712_v24  ;;  %v1059_v28 = vpop.f32.mrb[20].mxu1 }
 0x2c6   :  { %914 = vst [vmem:[%s1276_s6 + $0x28] sm:$0xff] %v898_v26   ;;  %v698_v29 = vadd.f32 %v1059_v28, %v829_v49  ;;  %v689_v30 = vpop.f32.mrb[21].mxu1 }
 0x2c7   :  { %913 = vst [vmem:[%s1276_s6 + $0x20] sm:$0xff] %v893_v27   ;;  %v690_v31 = vadd.f32 %v829_v49, %v689_v30  ;;  %v1060_v32 = vpop.f32.mrb[22].mxu1 }
 0x2c8   :  { %v701_v33 = vadd.f32 %v1060_v32, %v829_v49  ;;  %v692_v34 = vpop.f32.mrb[23].mxu1  ;;  %v718_v36 = vmax.f32 %v698_v29, 0.0 }
 0x2c9   :  { %v693_v35 = vadd.f32 %v829_v49, %v692_v34  ;;  %v716_v38 = vmax.f32 %v690_v31, 0.0 }
 0x2ca   :  { %v719_v37 = vmax.f32 %v701_v33, 0.0 }
 0x2cb   :  { %v717_v39 = vmax.f32 %v693_v35, 0.0 }
 0x2cc   :  { %v908_v40 = vpack.c.bf16 %v719_v37, %v718_v36 }
 0x2cd   :  { %v903_v41 = vpack.c.bf16 %v717_v39, %v716_v38 }
 0x2ce   :  { %916 = vst [vmem:[%s1276_s6 + $0x38] sm:$0xff] %v908_v40  }
 0x2cf   :  { %915 = vst [vmem:[%s1276_s6 + $0x30] sm:$0xff] %v903_v41  }

// kernel: server_gin_forward.7
= control target key start
LH: loop header
LB: loop body
LE: loop exit
PB: predicated region body
PF: predicated region fallthrough
CT: control target
= control target key end

     0   :  { %v527_v0 = vmov 0.0   ;;  %vm528_vm0 = vmmov 0   ;;  %vm366_vm1 = vcmask 31744   ;;  %s681_s1 = inlined_call_operand.vmem [shape: bf16[128,128], index: 1, kind: input, shape index: {}]   ;;  %s682_s2 = inlined_call_operand.vmem [shape: bf16[128,128], index: 2, kind: input, shape index: {}]   ;;  %s683_s0 = inlined_call_operand.vmem [shape: bf16[8,128], index: 0, kind: input, shape index: {}]   ;;  %s684_s4 = inlined_call_operand.vmem [shape: bf16[128,4], index: 4, kind: input, shape index: {}]   ;;  %s685_s3 = inlined_call_operand.vmem [shape: f32[1,128], index: 3, kind: input, shape index: {}]   ;;  %s686_s5 = inlined_call_operand.vmem [shape: f32[1,4], index: 5, kind: input, shape index: {}]   ;;  %s687_s6 = inlined_call_operand.vmem [shape: f32[8,4], index: 6, kind: output, shape index: {}]  }
   0x1   :  { %437 = vmatprep.subr.bf16.mxu0 %v527_v0  ;;  %v499_v1 = vld [vmem:[%s681_s1] sm:$0xff]   ;;  %453 = vmatprep.mubr.msk.bf16.mxu0 %vm528_vm0, %v527_v0  ;;  %v500_v2 = vld [vmem:[%s681_s1 + $0x8] sm:$0xff]   ;;  %v501_v3 = vld [vmem:[%s681_s1 + $0x10] sm:$0xff]  }
   0x2   :  { %457 = vmatprep.subr.bf16.mxu1 %v527_v0  ;;  %473 = vmatprep.mubr.msk.bf16.mxu1 %vm528_vm0, %v527_v0  ;;  %v507_v4 = vld [vmem:[%s682_s2] sm:$0xff]   ;;  %v502_v5 = vld [vmem:[%s681_s1 + $0x18] sm:$0xff]   ;;  %v508_v6 = vld [vmem:[%s682_s2 + $0x8] sm:$0xff]  }
   0x3   :  { %438 = vmatpush3.bf16.msra.mxu0 %v499_v1  ;;  %458 = vmatpush3.bf16.msra.mxu1 %v507_v4  ;;  %v503_v7 = vld [vmem:[%s681_s1 + $0x20] sm:$0xff]   ;;  %v509_v8 = vld [vmem:[%s682_s2 + $0x10] sm:$0xff]   ;;  %v504_v9 = vld [vmem:[%s681_s1 + $0x28] sm:$0xff]  }
   0x4   :  { %439 = vmatprep.subr.bf16.mxu0 %v527_v0  ;;  %459 = vmatprep.subr.bf16.mxu1 %v527_v0  ;;  %v510_v10 = vld [vmem:[%s682_s2 + $0x18] sm:$0xff]   ;;  %v505_v11 = vld [vmem:[%s681_s1 + $0x30] sm:$0xff]   ;;  %v511_v12 = vld [vmem:[%s682_s2 + $0x20] sm:$0xff]  }
   0x5   :  { %v506_v13 = vld [vmem:[%s681_s1 + $0x38] sm:$0xff]   ;;  %v512_v14 = vld [vmem:[%s682_s2 + $0x28] sm:$0xff]   ;;  %v30_v15 = vld [vmem:[%s683_s0] sm:$0xf] }
   0x6   :  { %v513_v16 = vld [vmem:[%s682_s2 + $0x30] sm:$0xff]   ;;  %v514_v17 = vld [vmem:[%s682_s2 + $0x38] sm:$0xff]   ;;  %v515_v18 = vld [vmem:[%s684_s4] sm:$0xff]  }
   0x7   :  { %440 = vmatpush3.bf16.msra.mxu0 %v500_v2  ;;  %460 = vmatpush3.bf16.msra.mxu1 %v508_v6  ;;  %v516_v19 = vld [vmem:[%s684_s4 + $0x8] sm:$0xff]   ;;  %v517_v20 = vld [vmem:[%s684_s4 + $0x10] sm:$0xff]   ;;  %v518_v21 = vld [vmem:[%s684_s4 + $0x18] sm:$0xff]  }
   0x8   :  { %441 = vmatprep.subr.bf16.mxu0 %v527_v0  ;;  %461 = vmatprep.subr.bf16.mxu1 %v527_v0  ;;  %v519_v22 = vld [vmem:[%s684_s4 + $0x20] sm:$0xff]   ;;  %v520_v23 = vld [vmem:[%s684_s4 + $0x28] sm:$0xff]   ;;  %v521_v29 = vld [vmem:[%s684_s4 + $0x30] sm:$0xff]  }
   0x9   :  { %v522_v30 = vld [vmem:[%s684_s4 + $0x38] sm:$0xff]   ;;  %v392_v31 = vld [vmem:[%s685_s3] ss:$0 sm:$0xff] }
   0xa   :  { %v401_v39 = vld [vmem:[%s686_s5] ss:$0 sm:$0xff] }
   0xb   :  { %442 = vmatpush3.bf16.msra.mxu0 %v501_v3  ;;  %462 = vmatpush3.bf16.msra.mxu1 %v509_v8 }
   0xc   :  { %443 = vmatprep.subr.bf16.mxu0 %v527_v0  ;;  %463 = vmatprep.subr.bf16.mxu1 %v527_v0 }
   0xf   :  { %444 = vmatpush3.bf16.msra.mxu0 %v502_v5  ;;  %464 = vmatpush3.bf16.msra.mxu1 %v510_v10 }
  0x10   :  { %445 = vmatprep.subr.bf16.mxu0 %v527_v0  ;;  %465 = vmatprep.subr.bf16.mxu1 %v527_v0 }
  0x13   :  { %446 = vmatpush3.bf16.msra.mxu0 %v503_v7  ;;  %466 = vmatpush3.bf16.msra.mxu1 %v511_v12 }
  0x14   :  { %447 = vmatprep.subr.bf16.mxu0 %v527_v0  ;;  %467 = vmatprep.subr.bf16.mxu1 %v527_v0 }
  0x17   :  { %448 = vmatpush3.bf16.msra.mxu0 %v504_v9  ;;  %468 = vmatpush3.bf16.msra.mxu1 %v512_v14 }
  0x18   :  { %449 = vmatprep.subr.bf16.mxu0 %v527_v0  ;;  %469 = vmatprep.subr.bf16.mxu1 %v527_v0 }
  0x1b   :  { %450 = vmatpush3.bf16.msra.mxu0 %v505_v11  ;;  %470 = vmatpush3.bf16.msra.mxu1 %v513_v16 }
  0x1c   :  { %451 = vmatprep.subr.bf16.mxu0 %v527_v0  ;;  %471 = vmatprep.subr.bf16.mxu1 %v527_v0 }
  0x1f   :  { %452 = vmatpush3.bf16.msra.mxu0 %v506_v13  ;;  %472 = vmatpush3.bf16.msra.mxu1 %v514_v17 }
  0x20   :  { %477 = vmatprep.subr.bf16.mxu0 %v527_v0 }
  0x22   :  { %454 = vmatmul.mubr.bf16.vlgmr.msra.gmra.mrb[0].mxu0 %v30_v15 }
  0x23   :  { %493 = vmatprep.mubr.msk.bf16.mxu0 %vm528_vm0, %v527_v0  ;;  %478 = vmatpush3.bf16.msra.mxu0 %v515_v18 }
  0x24   :  { %479 = vmatprep.subr.bf16.mxu0 %v527_v0 }
  0x27   :  { %480 = vmatpush3.bf16.msra.mxu0 %v516_v19 }
  0x28   :  { %481 = vmatprep.subr.bf16.mxu0 %v527_v0 }
  0x2b   :  { %482 = vmatpush3.bf16.msra.mxu0 %v517_v20 }
  0x2c   :  { %483 = vmatprep.subr.bf16.mxu0 %v527_v0 }
  0x2f   :  { %484 = vmatpush3.bf16.msra.mxu0 %v518_v21 }
  0x30   :  { %485 = vmatprep.subr.bf16.mxu0 %v527_v0 }
  0x33   :  { %486 = vmatpush3.bf16.msra.mxu0 %v519_v22 }
  0x34   :  { %487 = vmatprep.subr.bf16.mxu0 %v527_v0 }
  0x37   :  { %488 = vmatpush3.bf16.msra.mxu0 %v520_v23 }
  0x38   :  { %489 = vmatprep.subr.bf16.mxu0 %v527_v0 }
  0x3b   :  { %490 = vmatpush3.bf16.msra.mxu0 %v521_v29 }
  0x3c   :  { %491 = vmatprep.subr.bf16.mxu0 %v527_v0 }
  0x3f   :  { %492 = vmatpush3.bf16.msra.mxu0 %v522_v30 }
  0xf5   :  { %v129_v24 = vpop.f32.mrb[0].mxu0 }
  0xf6   :  { %v141_v25 = vpack.c.bf16 %v129_v24, %v129_v24  ;;  %v455_v26 = vpop.f32.mrb[1].mxu0 }
  0xf7   :  { %v132_v27 = vpop.f32.mrb[2].mxu0 }
  0xf8   :  { %v456_v28 = vpop.f32.mrb[3].mxu0  ;;  %474 = vmatmul.mubr.bf16.vlgmr.msra.gmra.mrb[0].mxu1 %v141_v25 }
 0x1cb   :  { %v247_v32 = vpop.f32.mrb[0].mxu1 }
 0x1cc   :  { %v248_v33 = vadd.f32 %v392_v31, %v247_v32  ;;  %v475_v34 = vpop.f32.mrb[1].mxu1 }
 0x1cd   :  { %v250_v35 = vpop.f32.mrb[2].mxu1 }
 0x1ce   :  { %v253_v36 = vmax.f32 %v248_v33, 0.0  ;;  %v476_v37 = vpop.f32.mrb[3].mxu1 }
 0x1d0   :  { %v254_v38 = vpack.c.bf16 %v253_v36, %v253_v36 }
 0x1d2   :  { %494 = vmatmul.mubr.bf16.vlgmr.msra.gmra.mrb[4].mxu0 %v254_v38 }
 0x2a5   :  { %v360_v40 = vpop.f32.mrb[4].mxu0 }
 0x2a6   :  { %v361_v41 = vadd.f32 %v401_v39, %v360_v40  ;;  %v495_v42 = vpop.f32.mrb[5].mxu0 }
 0x2a7   :  { %v363_v43 = vpop.f32.mrb[6].mxu0 }
 0x2a8   :  { %v496_v44 = vpop.f32.mrb[7].mxu0  ;;  %v367_v45 = vsel %vm366_vm1, %v361_v41, -inf }
 0x2a9   :  { %368 = vmax.xlane.f32.xlu0 %v367_v45 }
 0x336   :  { %v369_v46 = vpop.xlane.xlu0 %368 }
 0x337   :  { %v370_v47 = vsub.f32 %v361_v41, %v369_v46 }
 0x339   :  { %v371_v48 = vmul.f32 1.442695, %v370_v47 }
 0x33b   :  { %523 = vpow2.f32 %v371_v48 }
 0x345   :  { %v524_v49 = vpop.eup %523 }
 0x346   :  { %v373_v50 = vsel %vm366_vm1, %v524_v49, 0.0 }
 0x347   :  { %374 = vadd.xlane.f32.xlu0 %v373_v50 }
 0x3d4   :  { %v375_v51 = vpop.xlane.xlu0 %374 }
 0x3d5   :  { %525 = vlog2.f32 %v375_v51 }
 0x3df   :  { %v526_v52 = vpop.eup %525 }
 0x3e0   :  { %v377_v53 = vmul.f32 0.6931472, %v526_v52 }
 0x3e2   :  { %v378_v54 = vsub.f32 %v370_v47, %v377_v53 }
 0x3e4   :  { %379 = vst.msk [vmem:[%s687_s6] sm:$0xff] %vm366_vm1, %v378_v54 }

</bundles_post_ra>
